<compile_context>
chip_gen: v7x
topology: tpu7x:2x2x1
jax: 0.10.0
libtpu: 0.0.40
codegen_flags: <defaults>
</compile_context>

<pallas_src>
import functools

import jax
import jax.numpy as jnp
import numpy as np
from jax.experimental import pallas as pl
from jax.experimental.pallas import tpu as pltpu


def _round_up(x, m):
    return (x + m - 1) // m * m


# ---------------------------------------------------------------------------
# Model-init-time parameter preparation (hoisted out of the forward pass).
# ---------------------------------------------------------------------------
def init_embedding_params(word_table, pos_table, type_table):
    """Build the fused block-diagonal embedding table once (like nn.Module init)."""
    Vw, Dw = word_table.shape
    Vp, Dp = pos_table.shape
    Vt, Dt = type_table.shape
    Dtot = Dw + Dp + Dt
    Dpad = _round_up(Dtot, 128)                 # lane-dense output width
    Vtot = Vw + Vp + Vt

    # Keep the caller's table dtype (bf16 tables stay bf16 -> half the HBM/VMEM
    # traffic); accumulation is always f32 via preferred_element_type.
    dtype = word_table.dtype
    fused = jnp.zeros((Vtot, Dpad), dtype)
    fused = fused.at[:Vw, :Dw].set(word_table.astype(dtype))
    fused = fused.at[Vw:Vw + Vp, Dw:Dw + Dp].set(pos_table.astype(dtype))
    fused = fused.at[Vw + Vp:, Dw + Dp:Dtot].set(type_table.astype(dtype))

    return {
        "table": fused,
        "vocab_sizes": (Vw, Vp, Vt),
        "feat_sizes": (Dw, Dp, Dt),
        "d_total": Dtot,
        "d_pad": Dpad,
    }


# ---------------------------------------------------------------------------
# Kernels
# ---------------------------------------------------------------------------
def _onehot_gather(ids_ref, tab_ref):
    """Fused one-hot gather against the block-diagonal table.

    ids_ref: (TILE_N, 3) int32, already offset into the fused vocab axis.
    tab_ref: (Vtot, Dpad), fully resident.
    returns: (TILE_N, Dpad) f32.
    """
    # TODO(synk): for tiny Vtot a direct row gather (jnp.take on the VMEM table)
    # may beat the one-hot + MXU path; keep whichever measures faster.
    ids = ids_ref[...]
    tile_n = ids.shape[0]
    vtot = tab_ref.shape[0]
    lane = jax.lax.broadcasted_iota(jnp.int32, (tile_n, vtot), 1)
    onehot = ((ids[:, 0:1] == lane) |
              (ids[:, 1:2] == lane) |
              (ids[:, 2:3] == lane)).astype(tab_ref.dtype)       # (TILE_N, Vtot)
    return jnp.dot(onehot, tab_ref[...], preferred_element_type=jnp.float32)


def _embed_kernel(ids_ref, tab_ref, out_ref):
    """Eval-mode kernel: fused gather, no dropout, no seed input."""
    out_ref[...] = _onehot_gather(ids_ref, tab_ref).astype(out_ref.dtype)


def _hash_bits(counter, seed):
    """Counter-based uint32 hash (murmur3-style finalizer). Pure VPU int ops,
    so it lowers on Mosaic and in interpret mode alike (no pltpu.prng_*)."""
    x = counter ^ (seed * jnp.uint32(0x9E3779B9) + jnp.uint32(0x85EBCA6B))
    x = x ^ (x >> 16)
    x = x * jnp.uint32(0x7FEB352D)
    x = x ^ (x >> 15)
    x = x * jnp.uint32(0x846CA68B)
    x = x ^ (x >> 16)
    return x


def _embed_dropout_kernel(seed_ref, ids_ref, tab_ref, out_ref, *,
                          keep_threshold, scale, tile_n, d_pad):
    """Train-mode kernel: fused gather + inverted dropout (hash-based mask)."""
    fused = _onehot_gather(ids_ref, tab_ref)

    row = jax.lax.broadcasted_iota(jnp.int32, fused.shape, 0)
    col = jax.lax.broadcasted_iota(jnp.int32, fused.shape, 1)
    # Global element counter: independent stream per tile and per element.
    counter = ((pl.program_id(0) * tile_n + row) * d_pad + col).astype(jnp.uint32)
    seed = seed_ref[0].astype(jnp.uint32)
    bits = _hash_bits(counter, seed)
    keep = bits >= jnp.uint32(keep_threshold)
    fused = fused * jnp.where(keep, jnp.float32(scale), jnp.float32(0.0))

    out_ref[...] = fused.astype(out_ref.dtype)


# ---------------------------------------------------------------------------
# Forward wrapper
# ---------------------------------------------------------------------------
def embeddings_forward(params, tokens, part_of_speeches, types,
                       dropout_p=0.0, seed=0, tile_n=1024):
    """JAX wrapper reproducing Embeddings.forward.

    tokens / part_of_speeches / types: int [B, S]
    returns: [B, S, Dw + Dp + Dt] f32
    """
    table = params["table"]
    Vw, Vp, Vt = params["vocab_sizes"]
    Dtot = params["d_total"]
    Dpad = params["d_pad"]
    Vtot = Vw + Vp + Vt

    B, S = tokens.shape
    N = B * S

    # Clamp each id into its own segment, then offset into the fused vocab axis.
    tok = jnp.clip(tokens.reshape(N).astype(jnp.int32), 0, Vw - 1)
    pos = jnp.clip(part_of_speeches.reshape(N).astype(jnp.int32), 0, Vp - 1) + Vw
    typ = jnp.clip(types.reshape(N).astype(jnp.int32), 0, Vt - 1) + Vw + Vp
    ids = jnp.stack([tok, pos, typ], axis=1)        # (N, 3): one DMA per tile

    # Tile the token axis (multiple of 8 sublanes).  Cap the tile so there are
    # at least two grid steps when possible (v7x two-TensorCore sharding).
    half = _round_up(max(1, -(-N // 2)), 8)
    tile_n = max(8, min(_round_up(tile_n, 8), half))
    n_pad = _round_up(N, tile_n)
    if n_pad != N:
        ids = jnp.pad(ids, ((0, n_pad - N), (0, 0)))   # padded rows trimmed below
    grid = (n_pad // tile_n,)

    id_spec = pl.BlockSpec((tile_n, 3), lambda i, *_: (i, 0))
    out_spec = pl.BlockSpec((tile_n, Dpad), lambda i, *_: (i, 0))
    tab_idx = lambda i, *_: (0, 0)                     # grid-invariant (resident)
    try:
        # Single-buffer the resident table: halves its VMEM footprint.
        tab_spec = pl.BlockSpec((Vtot, Dpad), tab_idx, pipeline_mode=pl.Buffered(1))
    except Exception:  # older jax without pipeline_mode support
        tab_spec = pl.BlockSpec((Vtot, Dpad), tab_idx)

    out_shape = jax.ShapeDtypeStruct((n_pad, Dpad), jnp.float32)
    cparams = pltpu.CompilerParams(dimension_semantics=("parallel",))
    cost = pl.CostEstimate(
        flops=2 * n_pad * Vtot * Dpad,
        transcendentals=0,
        bytes_accessed=(table.size * table.dtype.itemsize
                        + ids.size * ids.dtype.itemsize
                        + n_pad * Dpad * 4))

    p = float(dropout_p)
    if p > 0.0:
        scale = 1.0 / (1.0 - p)
        keep_threshold = min(int(round(p * (1 << 32))), (1 << 32) - 1)
        kernel = functools.partial(_embed_dropout_kernel,
                                   keep_threshold=keep_threshold, scale=scale,
                                   tile_n=tile_n, d_pad=Dpad)
        grid_spec = pltpu.PrefetchScalarGridSpec(
            num_scalar_prefetch=1, grid=grid,
            in_specs=[id_spec, tab_spec], out_specs=out_spec)
        seed_arr = jnp.asarray([seed], dtype=jnp.int32)
        out = pl.pallas_call(
            kernel, out_shape=out_shape, grid_spec=grid_spec,
            compiler_params=cparams, cost_estimate=cost,
        )(seed_arr, ids, table)
    else:
        grid_spec = pltpu.PrefetchScalarGridSpec(
            num_scalar_prefetch=0, grid=grid,
            in_specs=[id_spec, tab_spec], out_specs=out_spec)
        out = pl.pallas_call(
            _embed_kernel, out_shape=out_shape, grid_spec=grid_spec,
            compiler_params=cparams, cost_estimate=cost,
        )(ids, table)

    # Trim row / lane padding only when present; in the full model the consumer
    # would accept the lane-padded (Dpad) layout and this slice would be fused.
    if n_pad != N or Dpad != Dtot:
        out = out[:N, :Dtot]
    return out.reshape(B, S, Dtot)


# ---------------------------------------------------------------------------
# Self-test
# ---------------------------------------------------------------------------
if __name__ == "__main__":
    key = jax.random.PRNGKey(0)
    k1, k2, k3, k4, k5, k6 = jax.random.split(key, 6)

    # Small synthetic config (deterministic, no checkpoint load).
    B, S = 2, 8
    vocab_size, vocab_dim = 32, 32           # pretrained-style word embeddings
    pos_vocab, pos_size = 16, 8              # len(maps['part_of_speeches']), part_of_speeches_size
    type_vocab, type_size = 8, 8             # len(maps['types']), types_size
    Dtot = vocab_dim + pos_size + type_size

    word_table = jax.random.normal(k1, (vocab_size, vocab_dim), dtype=jnp.float32)
    pos_table = jax.random.normal(k2, (pos_vocab, pos_size), dtype=jnp.float32)
    type_table = jax.random.normal(k3, (type_vocab, type_size), dtype=jnp.float32)

    tokens = jax.random.randint(k4, (B, S), 0, vocab_size, dtype=jnp.int32)
    part_of_speeches = jax.random.randint(k5, (B, S), 0, pos_vocab, dtype=jnp.int32)
    types = jax.random.randint(k6, (B, S), 0, type_vocab, dtype=jnp.int32)

    # "Model init": fused table built once, outside the forward pass.
    params = init_embedding_params(word_table, pos_table, type_table)

    # Pure-JAX reference (embedding lookup + concat).
    ref = jnp.concatenate(
        [jnp.take(word_table, tokens, axis=0),
         jnp.take(pos_table, part_of_speeches, axis=0),
         jnp.take(type_table, types, axis=0)],
        axis=2,
    )
    ref_np = np.asarray(ref)

    # Eval-mode (dropout = 0): exact match against reference.
    out = embeddings_forward(params, tokens, part_of_speeches, types,
                             dropout_p=0.0)
    out = jax.block_until_ready(out)
    assert out.shape == (B, S, Dtot)
    np.testing.assert_allclose(np.asarray(out), ref_np, rtol=1e-5, atol=1e-5)

    # Train-mode (dropout = 0.5): every surviving element equals ref / (1 - p).
    # (Does not bit-match torch's RNG; only the inverted-dropout semantics.)
    out_d = embeddings_forward(params, tokens, part_of_speeches, types,
                               dropout_p=0.5, seed=123)
    out_d = np.asarray(jax.block_until_ready(out_d))
    assert out_d.shape == (B, S, Dtot)
    nz = out_d != 0.0
    np.testing.assert_allclose(out_d[nz], 2.0 * ref_np[nz], rtol=1e-5, atol=1e-5)

    print("KERNEL_OK")
</pallas_src>

<mosaic_0001>
module attributes {stable_mosaic.version = 11 : i64} {
  func.func @_embed_kernel(%arg0: i32, %arg1: memref<8x3xi32, #tpu.memory_space<vmem>>, %arg2: memref<56x128xf32, #tpu.memory_space<vmem>>, %arg3: memref<8x128xf32, #tpu.memory_space<vmem>>) attributes {dimension_semantics = [#tpu.dimension_semantics<parallel>], iteration_bounds = array<i64: 2>, scalar_prefetch = 0 : i64, scratch_operands = 0 : i64, tpu.core_type = #tpu.core_type<tc>, window_params = [{transform_indices = @transform_0, window_bounds = array<i64: 8, 3>}, {pipeline_mode = #tpu.pipeline_mode<synchronous>, transform_indices = @transform_1, window_bounds = array<i64: 56, 128>}, {transform_indices = @transform_2, window_bounds = array<i64: 8, 128>}]} {
    %c0 = arith.constant 0 : index
    %c0_0 = arith.constant 0 : index
    %0 = vector.load %arg1[%c0, %c0_0] : memref<8x3xi32, #tpu.memory_space<vmem>>, vector<8x3xi32>
    %1 = tpu.iota {dimensions = array<i32: 1>} : vector<8x56xi32>
    %2 = vector.extract_strided_slice %0 {offsets = [0, 0], sizes = [8, 1], strides = [1, 1]} : vector<8x3xi32> to vector<8x1xi32>
    %3 = vector.broadcast %2 : vector<8x1xi32> to vector<8x56xi32>
    %4 = arith.cmpi eq, %3, %1 : vector<8x56xi32>
    %5 = vector.extract_strided_slice %0 {offsets = [0, 1], sizes = [8, 1], strides = [1, 1]} : vector<8x3xi32> to vector<8x1xi32>
    %6 = vector.broadcast %5 : vector<8x1xi32> to vector<8x56xi32>
    %7 = arith.cmpi eq, %6, %1 : vector<8x56xi32>
    %8 = arith.ori %4, %7 : vector<8x56xi1>
    %9 = vector.extract_strided_slice %0 {offsets = [0, 2], sizes = [8, 1], strides = [1, 1]} : vector<8x3xi32> to vector<8x1xi32>
    %10 = vector.broadcast %9 : vector<8x1xi32> to vector<8x56xi32>
    %11 = arith.cmpi eq, %10, %1 : vector<8x56xi32>
    %12 = arith.ori %8, %11 : vector<8x56xi1>
    %13 = arith.extui %12 : vector<8x56xi1> to vector<8x56xi32>
    %14 = arith.sitofp %13 : vector<8x56xi32> to vector<8x56xf32>
    %c0_1 = arith.constant 0 : index
    %c0_2 = arith.constant 0 : index
    %15 = vector.load %arg2[%c0_1, %c0_2] : memref<56x128xf32, #tpu.memory_space<vmem>>, vector<56x128xf32>
    %cst = arith.constant dense<0.000000e+00> : vector<8x128xf32>
    %16 = tpu.matmul %14, %15, %cst {dimension_numbers = #tpu.dot_dimension_numbers<[1], [0], [0], [1], [0, 0, 1, 1], [], []>} : vector<8x56xf32>, vector<56x128xf32>, vector<8x128xf32> -> vector<8x128xf32>
    %c0_3 = arith.constant 0 : index
    %c0_4 = arith.constant 0 : index
    %17 = vector.load %arg3[%c0_3, %c0_4] : memref<8x128xf32, #tpu.memory_space<vmem>>, vector<8x128xf32>
    tpu.vector_store %arg3[%c0_3, %c0_4], %16 {strides = array<i32>} : memref<8x128xf32, #tpu.memory_space<vmem>>, vector<8x128xf32>,
    return
  }
  func.func @transform_0(%arg0: i32) -> (i32, i32) {
    %c0_i32 = arith.constant 0 : i32
    %c0_i32_0 = arith.constant 0 : i32
    return %arg0, %c0_i32 : i32, i32
  }
  func.func @transform_1(%arg0: i32) -> (i32, i32) {
    %c0_i32 = arith.constant 0 : i32
    %c0_i32_0 = arith.constant 0 : i32
    %c0_i32_1 = arith.constant 0 : i32
    return %c0_i32, %c0_i32_0 : i32, i32
  }
  func.func @transform_2(%arg0: i32) -> (i32, i32) {
    %c0_i32 = arith.constant 0 : i32
    %c0_i32_0 = arith.constant 0 : i32
    return %arg0, %c0_i32 : i32, i32
  }
}

</mosaic_0001>

<bundles_post_ra>
// kernel: tpu_custom_call.1
= control target key start
LH: loop header
LB: loop body
LE: loop exit
PB: predicated region body
PF: predicated region fallthrough
CT: control target
= control target key end

     0   :  { %7 = vsyncpa [#allocation3], 0  ;;  %s706_s0 = inlined_call_operand.vmem [shape: s32[16,3], index: 0, kind: input, shape index: {}]   ;;  %s707_s1 = inlined_call_operand.hbm [shape: f32[56,128], index: 1, kind: input, shape index: {}]   ;;  %s708_s2 = inlined_call_operand.hbm [shape: f32[16,128], index: 2, kind: output, shape index: {}]  }
   0x1   :  { %8 = vsyncpa [#allocation4], 0 }
   0x2   :  { %10 = vsyncpa [#allocation4 + $0x1], 0  ;;  %s571_s9 = smov 0   ;;  %s573_s10 = smov 0  }
   0x3   :  { %s575_s11 = smov 0   ;;  %s577_s12 = smov 0  }
   0x4 LB: > { %s592_s13 = sadd.s32 4294967295, %s544_s12   ;;  %s340_s14 = sadd.s32 4294967294, %s544_s12   ;;  %s544_s12 = sphi %s577_s12, %s724_s12   ;;  %s540_s11 = sphi %s575_s11, %s723_s11   ;;  %s536_s10 = sphi %s573_s10, %s722_s10   ;;  %s532_s9 = sphi %s571_s9, %s721_s9  }
   0x5   : > { %s596_s15 = sadd.s32 1, %s544_s12   ;;  %s70_s16 = sadd.s32 1, %s540_s11 }
   0x6   : > { %s67_s17 = ssub.s32 %s544_s12, %s596_s15  ;;  %p80_p0 = scmp.ne.s32.totalorder %s540_s11, %s536_s10 }
   0x7   : > { %p68_p1 = scmp.eq.s32.totalorder %s67_s17, 0  ;;  %p81_p2 = scmp.eq.s32.totalorder %s592_s13, 1 }
   0x8   : > { %p86_p3 = scmp.ne.s32.totalorder %s536_s10, %s532_s9  ;;  %p87_p4 = scmp.eq.s32.totalorder %s340_s14, 1 }
   0x9   : > { %s607_s18 = scalar_select %p68_p1, %s540_s11, %s70_s16  }
   0xa   : > { %p609_p5 = por %p81_p2, %p80_p0  ;;  %p613_p6 = por %p87_p4, %p86_p3 }
   0xb   : > { %p341_p7 = scmp.ge.s32.totalorder %s544_s12, 1  ;;  %p94_p8 = scmp.lt.s32.totalorder %s544_s12, 3 }
   0xc   : > { %s712_s19 = scalar_select %p609_p5, 1, 0 }
   0xd   : > { %s713_s20 = scalar_select %p613_p6, 1, 0 }
   0xe   : > { %p709_p9 = scmp.eq.s32.totalorder %s592_s13, 0  ;;  %p620_p10 = pnand %p341_p7, %p94_p8 }
   0xf   : > { %s546_s22 = smov [#allocation2]   ;;  %s450_s27 = scalar_lea.hbm %s707_s1, 896 }
  0x10   : > { %s714_s21 = scalar_select %p620_p10, 1, 0 }
  0x11   : > { %s106_s23 = sshll.u32 %s546_s22, 4  ;;  %p394_p11 = pneg %p620_p10  ;;  %s107_s23 = int_to_ptr.vmem [resolvable:$true] %s106_s23 }
  0x12   : > { %p451_p13 = scmp.ne.s32.totalorder %s707_s1, %s450_s27  ;;  %p457_p3 = scmp.lt.u32.totalorder %s450_s27, %s707_s1 }
  0x13   : > { %p628_p12 = pnand %p709_p9, %p394_p11 }
  0x15   : > { %p452_p0 = pneg %p628_p12 }
  0x17   : > { %p453_p1 = pnand %p452_p0, %p451_p13 }
  0x19   : > { %p454_p2 = pneg %p453_p1 }
  0x1b   : > { %p459_p4 = pnand %p457_p3, %p454_p2 }
  0x1d   : > { %462 = shalt.err (!%p459_p4)
}
  0x1e   : > { %s463_s4 = scalar_lea.vmem %s107_s23, 896  ;;  %p471_p9 = scmp.lt.s32.totalorder %s107_s23, %s107_s23 }
  0x1f   : > { %p464_p7 = scmp.ne.s32.totalorder %s107_s23, %s463_s4  ;;  %p472_p6 = scmp.lt.s32.totalorder %s463_s4, %s463_s4 }
  0x21   : > { %p466_p8 = pnand %p464_p7, %p452_p0  ;;  %p473_p5 = por %p472_p6, %p471_p9 }
  0x23   : > { %p467_p11 = pneg %p466_p8 }
  0x25   : > { %p474_p10 = pnand %p473_p5, %p467_p11 }
  0x27   : > { %477 = shalt.err (!%p474_p10)
}
  0x28   : > { %s547_s5 = smov 128   ;;  %s548_s6 = smov 8  }
  0x29   : > { %397 = dma.hbm_to_vmem [thread:$0]  (!%p628_p12), %s707_s1, 896, %s107_s23, [#allocation3], %s547_s5, %s547_s5, %s548_s6  }
  0x2a   : > { %p716_p13 = scmp.ne.s32.totalorder %s714_s21, 0 }
  0x2b   : > { %p717_p1 = scmp.eq.s32.totalorder (!%p716_p13), %s592_s13, 0 }
  0x2c   : > { %129 = sbr.rel (%p716_p13) target bundleno = 422 (0x1a6), region = 28 }
  0x33   : > { %523 = dma.done.wait (%p717_p1), [#allocation3], 896   ;;  %p718_p0 = pmov %p717_p1 }
  0x34   : > { %p150_p5 = scmp.lt.s32.totalorder %s592_s13, 1  ;;  %v549_v0 = vmov 0   ;;  %v550_v1 = vmov 2   ;;  %v551_v2 = vmov 0.0|0.0   ;;  %v173_v4 = vld [vmem:[#allocation2] sm:$0xff]  ;;  %v174_v5 = vld [vmem:[#allocation2 + $0x8] sm:$0xff]  ;;  %v155_v16 = vlaneseq }
  0x35   : > { %525 = vsyncadd (%p718_p0), [#allocation3], 4294966400  ;;  %446 = vset.pattern.permute.xlu0 %v549_v0  ;;  %448 = vset.pattern.permute.xlu1 %v550_v1  ;;  %v380_v6 = vpack.c.bf16 %v174_v5, %v173_v4  ;;  %v175_v7 = vld [vmem:[#allocation2 + $0x10] sm:$0xff]  ;;  %v176_v8 = vld [vmem:[#allocation2 + $0x18] sm:$0xff]  ;;  %v552_v12 = vmov 1   ;;  %vm553_vm0 = vmmov 0  }
  0x36   : > { %s151_s14 = scalar_select %p150_p5, %s592_s13, 1  ;;  %379 = vmatprep.subr.bf16.mxu0 %v551_v2  ;;  %v383_v9 = vpack.c.bf16 %v176_v8, %v175_v7  ;;  %v177_v10 = vld [vmem:[#allocation2 + $0x20] sm:$0xff]  ;;  %v178_v11 = vld [vmem:[#allocation2 + $0x28] sm:$0xff]  ;;  %v554_v14 = vmov 0.0   ;;  %v179_v15 = vld [vmem:[#allocation2 + $0x30] sm:$0xff]  ;;  %v156_v18 = vand.u32 127, %v155_v16 }
  0x37   : > { %381 = vmatpush3.bf16.msra.mxu0 %v380_v6  ;;  %v386_v13 = vpack.c.bf16 %v178_v11, %v177_v10  ;;  %376 = vmatprep.mubr.msk.f32.mxu0 %vm553_vm0, %v554_v14  ;;  %vm180_vm5 = vcmask 457728   ;;  %s147_s23 = sand.u32 1, %s536_s10   ;;  %s351_s27 = sshll.u32 %s592_s13, 7 }
  0x38   : > { %s347_s16 = sshll.u32 %s151_s14, 3  ;;  %382 = vmatprep.subr.bf16.mxu0 %v551_v2  ;;  %s346_s24 = sshll.u32 %s147_s23, 3 }
  0x39   : > { %s153_s22 = scalar_lea.vmem %s706_s0, %s347_s16  ;;  %s149_s25 = scalar_lea.vmem [#allocation5], %s346_s24 }
  0x3a   : > { %v154_v3 = vld [vmem:[%s153_s22] sm:$0xff]  ;;  %s269_s26 = sshll.u32 %s149_s25, 4  ;;  %s666_s30 = scalar_lea.hbm %s708_s2, %s351_s27  ;;  %s661_s26 = int_to_ptr.vmem [resolvable:$true] %s269_s26 }
  0x3b   : > { %158 = vperm.xlu0 %446, %v154_v3   ;;  %167 = vperm.xlu1 %448, %v154_v3   ;;  %s256_s3 = scalar_lea.sflag [#allocation4], %s147_s23  ;;  %s478_s4 = scalar_lea.vmem %s661_s26, 128 }
  0x3c   : > { %384 = vmatpush3.bf16.msra.mxu0 %v383_v9  ;;  %p479_p6 = scmp.ne.s32.totalorder %s661_s26, %s478_s4  ;;  %p719_p9 = scmp.ne.s32.totalorder %s712_s19, 0 }
  0x3d   : > { %385 = vmatprep.subr.bf16.mxu0 %v551_v2  ;;  %s555_s13 = smov [#allocation5]  }
  0x3e   : > { %p480_p10 = pnand %p479_p6, %p719_p9  ;;  %s482_s5 = sshll.u32 %s555_s13, 4  ;;  %s483_s5 = int_to_ptr.vmem [resolvable:$false] %s482_s5 }
  0x3f   : > { %447 = vset.pattern.permute.xlu0 %v552_v12  ;;  %s484_s6 = scalar_lea.vmem %s483_s5, 256  ;;  %p485_p2 = scmp.lt.s32.totalorder %s661_s26, %s483_s5 }
  0x40   : > { %162 = vperm.xlu0 %447, %v154_v3   ;;  %387 = vmatpush3.bf16.msra.mxu0 %v386_v13  ;;  %p481_p12 = pneg %p480_p10  ;;  %p486_p3 = scmp.lt.s32.totalorder %s484_s6, %s478_s4 }
  0x41   : > { %374 = vmatprep.subr.mxu0 %v554_v14 }
  0x42   : > { %p487_p4 = por %p486_p3, %p485_p2 }
  0x44   : > { %449 = vset.pattern.permute.xlu0 %v550_v1  ;;  %375 = vmatpush3.msra.mxu0 %v179_v15  ;;  %p488_p7 = pnand %p487_p4, %p481_p12 }
  0xba   : > { %v159_v17 = vpop.permute.xlu0 %158  ;;  %v168_v19 = vpop.permute.xlu1 %167 }
  0xbb   : > { %vm169_vm1 = vcmp.eq.s32.totalorder %v168_v19, %v156_v18  ;;  %vm160_vm2 = vcmp.eq.s32.totalorder %v159_v17, %v156_v18 }
  0xbf   : > { %v163_v20 = vpop.permute.xlu0 %162 }
  0xc0   : > { %vm164_vm3 = vcmp.eq.s32.totalorder %v163_v20, %v156_v18 }
  0xc1   : > { %vm165_vm4 = vmor %vm160_vm2, %vm164_vm3 }
  0xc2   : > { %vm170_vm6 = vmor %vm165_vm4, %vm169_vm1 }
  0xc3   : > { %v348_v21 = vsel %vm170_vm6, 1.0, %v554_v14 }
  0xc4   : > { %377 = vmatmul.mubr.msk.f32.vlgmr.msra.gmra.mrb[0].mxu0 %vm180_vm5, %v348_v21 }
 0x197   : > { %v250_v22 = vpop.f32.mrb[0].mxu0 }
 0x198   : > { %254 = vst [vmem:[%s149_s25] sm:$0xff] %v250_v22  ;;  %v378_v23 = vpop.f32.mrb[1].mxu0 }
 0x199   : > { %491 = shalt.err (!%p488_p7)
}
 0x19a   : > { %s492_s7 = scalar_lea.hbm %s666_s30, 128  ;;  %s496_s16 = scalar_lea.hbm %s708_s2, 256 }
 0x19b   : > { %p493_p8 = scmp.ne.s32.totalorder %s666_s30, %s492_s7  ;;  %p497_p1 = scmp.lt.u32.totalorder %s666_s30, %s708_s2 }
 0x19c   : > { %p498_p0 = scmp.lt.u32.totalorder %s496_s16, %s492_s7  ;;  %p500_p6 = scmp.lt.u32.totalorder %s492_s7, %s666_s30 }
 0x19d   : > { %p494_p11 = pnand %p493_p8, %p719_p9 }
 0x19e   : > { %p499_p5 = por %p498_p0, %p497_p1 }
 0x19f   : > { %p495_p13 = pneg %p494_p11 }
 0x1a0   : > { %p501_p10 = por %p500_p6, %p499_p5 }
 0x1a2   : > { %p502_p12 = pnand %p501_p10, %p495_p13 }
 0x1a4   : > { %505 = shalt.err (!%p502_p12)
}
 0x1a5   : > { %392 = dma.vmem_to_hbm [thread:$0]  (%p719_p9), %s661_s26, 128, %s666_s30, %s256_s3  }
 0x1a6 PF: > { %p404_p2 = scmp.ge.s32.totalorder %s544_s12, 2  ;;  %s281_s22 = sand.u32 1, %s532_s9  }
 0x1a7   : > { %p720_p3 = scmp.ne.s32.totalorder %s713_s20, 0  ;;  %s282_s23 = scalar_lea.sflag [#allocation4], %s281_s22 }
 0x1a9   : > { %p399_p4 = pnand %p404_p2, %p720_p3 }
 0x1ab   : > { %527 = dma.done.wait (!%p399_p4), %s282_s23, 128  }
 0x1ac   : > { %529 = vsyncadd (!%p399_p4), %s282_s23, 4294967168  ;;  %p13_p7 = scmp.ge.s32.totalorder %s596_s15, 4   ;;  %s721_s9 = smov %s536_s10 }
 0x1ad   : > { %s722_s10 = smov %s540_s11  ;;  %s723_s11 = smov %s607_s18 }
 0x1ae   : > { %s724_s12 = smov %s596_s15  ;;  %15 = sbr.rel (!%p13_p7) target bundleno = 4 (0x4), region = 68 }
 0x1b5   :  { %287 = vsyncpa [#allocation3], 1 }
 0x1b6   :  { %289 = vsyncpa [#allocation3 + $0x1], 1 }
 0x1b7   :  { %290 = vsyncpa [#allocation4], 1 }
 0x1b8   :  { %292 = vsyncpa [#allocation4 + $0x1], 1 }

</bundles_post_ra>
